<compile_context>
chip_gen: v7x
topology: tpu7x:2x2x1
jax: 0.10.0
libtpu: 0.0.40
codegen_flags: <defaults>
</compile_context>

<pallas_src>
import functools

import jax
import jax.numpy as jnp
import numpy as np
from jax import lax
from jax.experimental import pallas as pl
from jax.experimental.pallas import tpu as pltpu

_MIN_NORM = 1e-15
_ARTANH_CLAMP = 1e-15   # PyTorch Artanh clamps to (-1+1e-15, 1-1e-15).
                        # NOTE: 1-1e-15 rounds to 1.0 in f32, so the clip is
                        # effectively inert; safety comes from project's
                        # eps=4e-3 guaranteeing sqrt_c*p_norm <= 1-4e-3.


def _round_up(x, m):
    return (x + m - 1) // m * m


def _ball_constants(c, dtype):
    """sqrt(c) and the max-norm radius used by `project` (HGCN convention)."""
    eps = 1e-5 if jnp.dtype(dtype) == jnp.dtype(jnp.float64) else 4e-3
    sqrt_c = float(np.sqrt(float(c)))
    maxnorm = (1.0 - eps) / sqrt_c
    return sqrt_c, maxnorm


def _scale_from_sumsq(sumsq, sqrt_c, maxnorm):
    """Fused project+logmap0 scale factor from per-vector sum of squares."""
    sumsq_c = jnp.maximum(sumsq, _MIN_NORM * _MIN_NORM)
    inv_norm = lax.rsqrt(sumsq_c)                    # EUP
    x_norm = sumsq_c * inv_norm                      # == sqrt(sumsq_c)
    m = jnp.minimum(1.0, maxnorm * inv_norm)         # project clip factor
    p_norm = jnp.minimum(x_norm, maxnorm)            # norm after projection
    z = jnp.clip(sqrt_c * p_norm, -1.0 + _ARTANH_CLAMP, 1.0 - _ARTANH_CLAMP)
    artanh_z = 0.5 * jnp.log((1.0 + z) / (1.0 - z))  # EUP log
    return m * artanh_z / (sqrt_c * p_norm)


def _fkernel_packed_kernel(x_ref, g_ref, o_ref, *, sqrt_c, maxnorm):
    """Lane-dense tile (block_rows, L), L = k*D multiple of 128.

    Each 128-lane row holds k feature vectors of length D back to back.
    (x*x) @ G (G block-diagonal 0/1) segment-reduces each D-lane group and
    broadcasts the per-vector sum of squares back across it in one MXU op.
    NOTE: padded rows of a ragged final block may compute garbage, but the
    lane-group matmul never mixes rows and their stores are dropped.
    """
    x = x_ref[...].astype(jnp.float32)
    sumsq = jnp.dot(x * x, g_ref[...], preferred_element_type=jnp.float32)
    alpha = _scale_from_sumsq(sumsq, sqrt_c, maxnorm)
    o_ref[...] = (x * alpha).astype(o_ref.dtype)


def _fkernel_rowwise_kernel(x_ref, o_ref, *, sqrt_c, maxnorm):
    """Fallback: one feature vector per row (D >= 128 or non-divisible)."""
    x = x_ref[...].astype(jnp.float32)
    sumsq = jnp.sum(x * x, axis=-1, keepdims=True)
    alpha = _scale_from_sumsq(sumsq, sqrt_c, maxnorm)
    o_ref[...] = (x * alpha).astype(o_ref.dtype)


def fkernel_reference(x, c=1.0):
    """Pure-JAX reference mirroring the PyTorch project + logmap0 semantics."""
    sqrt_c, maxnorm = _ball_constants(c, x.dtype)
    xf = x.astype(jnp.float32)
    x_norm = jnp.maximum(
        jnp.sqrt(jnp.sum(xf * xf, axis=-1, keepdims=True)), _MIN_NORM)
    p = jnp.where(x_norm > maxnorm, xf / x_norm * maxnorm, xf)
    p_norm = jnp.maximum(
        jnp.sqrt(jnp.sum(p * p, axis=-1, keepdims=True)), _MIN_NORM)
    z = jnp.clip(sqrt_c * p_norm, -1.0 + _ARTANH_CLAMP, 1.0 - _ARTANH_CLAMP)
    artanh_z = 0.5 * jnp.log((1.0 + z) / (1.0 - z))
    return (p * (artanh_z / (sqrt_c * p_norm))).astype(x.dtype)


def fkernel_pallas(x, c=1.0, *, block_bytes=2 * 1024 * 1024,
                   min_pallas_elements=1024):
    """JAX/Pallas equivalent of FKernel.forward: logmap0(project(x, c), c)."""
    orig_shape = x.shape
    orig_dtype = x.dtype
    if x.ndim == 0:
        raise ValueError("FKernel expects at least a 1-D input.")

    D = orig_shape[-1]
    R = int(np.prod(orig_shape[:-1])) if x.ndim > 1 else 1
    total = R * D

    # Tiny-input fast path: pallas_call launch overhead dwarfs the work.
    if total < min_pallas_elements:
        return fkernel_reference(x, c)

    sqrt_c, maxnorm = _ball_constants(c, orig_dtype)

    # Lane-dense repack when D divides the 128-lane vreg width and the flat
    # row count is a clean multiple of k (metadata-only reshape, no copy).
    if D < 128 and 128 % D == 0 and R % (128 // D) == 0:
        k = 128 // D
    else:
        k = 1
    Rp = R // k
    L = k * D

    # VMEM accounting: lane-padded width, 4 B/elem (conservative). The
    # pipeline holds 2x input + 2x output buffers (~4 * block_bytes) plus the
    # 64 KiB G matrix -> ~8.1 MiB at the 2 MiB default, safe on v5e's 16 MiB
    # scoped default and with headroom on v6e/v7x.
    lane_padded = _round_up(L, 128)
    bytes_per_row = lane_padded * 4
    block_rows = max(8, (int(block_bytes) // bytes_per_row) // 8 * 8)
    if block_rows >= Rp:
        block_rows = Rp                    # single block (full dim -> legal)
        grid = (1,)
    else:
        grid = (pl.cdiv(Rp, block_rows),)  # ragged tail masked by Pallas

    x2d = x.reshape(Rp, L)                 # metadata-only reshape, no padding

    cost = pl.CostEstimate(
        flops=int((6 + (2 * L if k > 1 else 0)) * total),
        transcendentals=int(2 * total if k > 1 else 2 * R),
        bytes_accessed=int(2 * total * jnp.dtype(orig_dtype).itemsize),
    )

    if k > 1:
        # (L, L) block-diagonal 0/1 matrix for the MXU segmented reduction;
        # constant index_map keeps it resident in VMEM across grid steps.
        gid = jnp.arange(L, dtype=jnp.int32) // D
        g = (gid[:, None] == gid[None, :]).astype(jnp.float32)
        kernel = functools.partial(_fkernel_packed_kernel,
                                   sqrt_c=sqrt_c, maxnorm=maxnorm)
        in_specs = [pl.BlockSpec((block_rows, L), lambda i: (i, 0)),
                    pl.BlockSpec((L, L), lambda i: (0, 0))]
        args = (x2d, g)
    else:
        kernel = functools.partial(_fkernel_rowwise_kernel,
                                   sqrt_c=sqrt_c, maxnorm=maxnorm)
        in_specs = [pl.BlockSpec((block_rows, L), lambda i: (i, 0))]
        args = (x2d,)

    out2d = pl.pallas_call(
        kernel,
        out_shape=jax.ShapeDtypeStruct((Rp, L), orig_dtype),
        grid=grid,
        in_specs=in_specs,
        out_specs=pl.BlockSpec((block_rows, L), lambda i: (i, 0)),
        compiler_params=pltpu.CompilerParams(
            dimension_semantics=("parallel",)),
        cost_estimate=cost,
    )(*args)

    return out2d.reshape(orig_shape)


if __name__ == "__main__":
    key = jax.random.PRNGKey(0)
    k1, k2, k3, k4 = jax.random.split(key, 4)
    c = 1.0

    # (num_nodes, hidden): half outside the ball (project clips), half inside.
    x1 = jax.random.normal(k1, (64, 32), dtype=jnp.float32)
    x1 = x1.at[32:].multiply(0.05)
    y1 = jax.block_until_ready(fkernel_pallas(x1, c))
    np.testing.assert_allclose(np.asarray(y1),
                               np.asarray(fkernel_reference(x1, c)),
                               rtol=1e-4, atol=1e-5)

    # Batched 3-D input with a different curvature (lane-dense packed path).
    x2 = jax.random.normal(k2, (2, 128, 32), dtype=jnp.float32) * 0.3
    y2 = jax.block_until_ready(fkernel_pallas(x2, 0.5))
    np.testing.assert_allclose(np.asarray(y2),
                               np.asarray(fkernel_reference(x2, 0.5)),
                               rtol=1e-4, atol=1e-5)

    # Non-divisible packed row count + small block -> multi-step cdiv grid
    # with a masked ragged final block.
    x3 = jax.random.normal(k3, (100, 32), dtype=jnp.float32)
    y3 = jax.block_until_ready(fkernel_pallas(x3, c, block_bytes=8 * 128 * 4))
    np.testing.assert_allclose(np.asarray(y3),
                               np.asarray(fkernel_reference(x3, c)),
                               rtol=1e-4, atol=1e-5)

    # D >= 128 exercises the row-wise fallback kernel (no repack).
    x4 = jax.random.normal(k4, (64, 256), dtype=jnp.float32) * 0.4
    y4 = jax.block_until_ready(fkernel_pallas(x4, c))
    np.testing.assert_allclose(np.asarray(y4),
                               np.asarray(fkernel_reference(x4, c)),
                               rtol=1e-4, atol=1e-5)

    # Tiny input exercises the non-Pallas fast path.
    x5 = jax.random.normal(key, (2, 8), dtype=jnp.float32) * 0.1
    y5 = jax.block_until_ready(fkernel_pallas(x5, c))
    np.testing.assert_allclose(np.asarray(y5),
                               np.asarray(fkernel_reference(x5, c)),
                               rtol=1e-4, atol=1e-5)

    print("KERNEL_OK")
</pallas_src>

<mosaic_0001>
module attributes {stable_mosaic.version = 11 : i64} {
  func.func @_fkernel_packed_kernel(%arg0: i32, %arg1: memref<16x128xf32, #tpu.memory_space<vmem>>, %arg2: memref<128x128xf32, #tpu.memory_space<vmem>>, %arg3: memref<16x128xf32, #tpu.memory_space<vmem>>) attributes {dimension_semantics = [#tpu.dimension_semantics<parallel>], iteration_bounds = array<i64: 1>, scalar_prefetch = 0 : i64, scratch_operands = 0 : i64, tpu.core_type = #tpu.core_type<tc>, window_params = [{transform_indices = @transform_0, window_bounds = array<i64: 16, 128>}, {pipeline_mode = #tpu.pipeline_mode<synchronous>, transform_indices = @transform_1, window_bounds = array<i64: 128, 128>}, {transform_indices = @transform_2, window_bounds = array<i64: 16, 128>}]} {
    %c0 = arith.constant 0 : index
    %c0_0 = arith.constant 0 : index
    %0 = vector.load %arg1[%c0, %c0_0] : memref<16x128xf32, #tpu.memory_space<vmem>>, vector<16x128xf32>
    %1 = arith.mulf %0, %0 : vector<16x128xf32>
    %c0_1 = arith.constant 0 : index
    %c0_2 = arith.constant 0 : index
    %2 = vector.load %arg2[%c0_1, %c0_2] : memref<128x128xf32, #tpu.memory_space<vmem>>, vector<128x128xf32>
    %cst = arith.constant dense<0.000000e+00> : vector<16x128xf32>
    %3 = tpu.matmul %1, %2, %cst {dimension_numbers = #tpu.dot_dimension_numbers<[1], [0], [0], [1], [0, 0, 1, 1], [], []>} : vector<16x128xf32>, vector<128x128xf32>, vector<16x128xf32> -> vector<16x128xf32>
    %cst_3 = arith.constant 1.000000e-30 : f32
    %4 = vector.broadcast %cst_3 : f32 to vector<16x128xf32>
    %5 = arith.maximumf %3, %4 : vector<16x128xf32>
    %6 = math.rsqrt %5 : vector<16x128xf32>
    %7 = arith.mulf %5, %6 : vector<16x128xf32>
    %cst_4 = arith.constant 0.995999991 : f32
    %8 = vector.broadcast %cst_4 : f32 to vector<16x128xf32>
    %9 = arith.mulf %8, %6 : vector<16x128xf32>
    %cst_5 = arith.constant 1.000000e+00 : f32
    %10 = vector.broadcast %cst_5 : f32 to vector<16x128xf32>
    %11 = arith.minimumf %10, %9 : vector<16x128xf32>
    %cst_6 = arith.constant 0.995999991 : f32
    %12 = vector.broadcast %cst_6 : f32 to vector<16x128xf32>
    %13 = arith.minimumf %7, %12 : vector<16x128xf32>
    %cst_7 = arith.constant 1.000000e+00 : f32
    %14 = vector.broadcast %cst_7 : f32 to vector<16x128xf32>
    %15 = arith.mulf %14, %13 : vector<16x128xf32>
    %cst_8 = arith.constant -1.000000e+00 : f32
    %cst_9 = arith.constant 1.000000e+00 : f32
    %16 = vector.broadcast %cst_8 : f32 to vector<16x128xf32>
    %17 = arith.maximumf %16, %15 : vector<16x128xf32>
    %18 = vector.broadcast %cst_9 : f32 to vector<16x128xf32>
    %19 = arith.minimumf %18, %17 : vector<16x128xf32>
    %cst_10 = arith.constant 1.000000e+00 : f32
    %20 = vector.broadcast %cst_10 : f32 to vector<16x128xf32>
    %21 = arith.addf %20, %19 : vector<16x128xf32>
    %cst_11 = arith.constant 1.000000e+00 : f32
    %22 = vector.broadcast %cst_11 : f32 to vector<16x128xf32>
    %23 = arith.subf %22, %19 : vector<16x128xf32>
    %24 = arith.divf %21, %23 : vector<16x128xf32>
    %25 = math.log %24 : vector<16x128xf32>
    %cst_12 = arith.constant 5.000000e-01 : f32
    %26 = vector.broadcast %cst_12 : f32 to vector<16x128xf32>
    %27 = arith.mulf %26, %25 : vector<16x128xf32>
    %28 = arith.mulf %11, %27 : vector<16x128xf32>
    %cst_13 = arith.constant 1.000000e+00 : f32
    %29 = vector.broadcast %cst_13 : f32 to vector<16x128xf32>
    %30 = arith.mulf %29, %13 : vector<16x128xf32>
    %31 = arith.divf %28, %30 : vector<16x128xf32>
    %32 = arith.mulf %0, %31 : vector<16x128xf32>
    %c0_14 = arith.constant 0 : index
    %c0_15 = arith.constant 0 : index
    %33 = vector.load %arg3[%c0_14, %c0_15] : memref<16x128xf32, #tpu.memory_space<vmem>>, vector<16x128xf32>
    tpu.vector_store %arg3[%c0_14, %c0_15], %32 {strides = array<i32>} : memref<16x128xf32, #tpu.memory_space<vmem>>, vector<16x128xf32>,
    return
  }
  func.func @transform_0(%arg0: i32) -> (i32, i32) {
    %c0_i32 = arith.constant 0 : i32
    %c0_i32_0 = arith.constant 0 : i32
    return %arg0, %c0_i32 : i32, i32
  }
  func.func @transform_1(%arg0: i32) -> (i32, i32) {
    %c0_i32 = arith.constant 0 : i32
    %c0_i32_0 = arith.constant 0 : i32
    %c0_i32_1 = arith.constant 0 : i32
    return %c0_i32, %c0_i32_0 : i32, i32
  }
  func.func @transform_2(%arg0: i32) -> (i32, i32) {
    %c0_i32 = arith.constant 0 : i32
    %c0_i32_0 = arith.constant 0 : i32
    return %arg0, %c0_i32 : i32, i32
  }
}

</mosaic_0001>

<bundles_post_ra>
// kernel: tpu_custom_call.1
= control target key start
LH: loop header
LB: loop body
LE: loop exit
PB: predicated region body
PF: predicated region fallthrough
CT: control target
= control target key end

     0   :  { %7 = vsyncpa [#allocation3], 0  ;;  %s443_s0 = inlined_call_operand.hbm [shape: f32[16,128], index: 0, kind: input, shape index: {}]   ;;  %s444_s1 = inlined_call_operand.hbm [shape: f32[128,128], index: 1, kind: input, shape index: {}]   ;;  %s445_s2 = inlined_call_operand.hbm [shape: f32[16,128], index: 2, kind: output, shape index: {}]  }
   0x1   :  { %8 = vsyncpa [#allocation6], 0 }
   0x2   :  { %9 = vsyncpa [#allocation4], 0  ;;  %s373_s9 = smov [#allocation2]   ;;  %s301_s13 = scalar_lea.hbm %s443_s0, 256 }
   0x3   :  { %s15_s10 = sshll.u32 %s373_s9, 4  ;;  %p302_p0 = scmp.ne.s32.totalorder %s443_s0, %s301_s13  ;;  %s16_s10 = int_to_ptr.vmem [resolvable:$true] %s15_s10 }
   0x4   :  { %p305_p1 = scmp.lt.u32.totalorder %s301_s13, %s443_s0 }
   0x6   :  { %p307_p2 = pnand %p305_p1, %p302_p0 }
   0x8   :  { %310 = shalt.err (!%p307_p2)
}
   0x9   :  { %s311_s18 = scalar_lea.vmem %s16_s10, 256  ;;  %p316_p4 = scmp.lt.s32.totalorder %s16_s10, %s16_s10 }
   0xa   :  { %p312_p3 = scmp.ne.s32.totalorder %s16_s10, %s311_s18  ;;  %p317_p5 = scmp.lt.s32.totalorder %s311_s18, %s311_s18 }
   0xc   :  { %p318_p6 = por %p317_p5, %p316_p4 }
   0xe   :  { %p319_p7 = pnand %p318_p6, %p312_p3 }
  0x10   :  { %322 = shalt.err (!%p319_p7)
}
  0x11   :  { %s374_s19 = smov 128   ;;  %s375_s20 = smov 8  }
  0x12   :  { %21 = dma.hbm_to_vmem [thread:$0]  %s443_s0, 256, %s16_s10, [#allocation3], %s374_s19, %s374_s19, %s375_s20  }
  0x13   :  { %s376_s23 = smov [#allocation5]   ;;  %s323_s27 = scalar_lea.hbm %s444_s1, 2048 }
  0x14   :  { %s27_s24 = sshll.u32 %s376_s23, 4  ;;  %p324_p8 = scmp.ne.s32.totalorder %s444_s1, %s323_s27  ;;  %s28_s24 = int_to_ptr.vmem [resolvable:$true] %s27_s24 }
  0x15   :  { %p327_p9 = scmp.lt.u32.totalorder %s323_s27, %s444_s1 }
  0x17   :  { %p329_p10 = pnand %p327_p9, %p324_p8 }
  0x19   :  { %332 = shalt.err (!%p329_p10)
}
  0x1a   :  { %s333_s4 = scalar_lea.vmem %s28_s24, 2048  ;;  %p338_p12 = scmp.lt.s32.totalorder %s28_s24, %s28_s24 }
  0x1b   :  { %p334_p11 = scmp.ne.s32.totalorder %s28_s24, %s333_s4  ;;  %p339_p13 = scmp.lt.s32.totalorder %s333_s4, %s333_s4 }
  0x1d   :  { %p340_p0 = por %p339_p13, %p338_p12 }
  0x1f   :  { %p341_p1 = pnand %p340_p0, %p334_p11 }
  0x21   :  { %344 = shalt.err (!%p341_p1)
}
  0x22   :  { %33 = dma.hbm_to_vmem [thread:$0]  %s444_s1, 2048, %s28_s24, [#allocation6], %s374_s19, %s374_s19, %s375_s20  }
  0x23   :  { %367 = dma.done.wait [#allocation3], 256  }
  0x24   :  { %368 = vsyncadd [#allocation3], 4294967040 }
  0x25   :  { %369 = dma.done.wait [#allocation6], 2048  }
  0x26   :  { %370 = vsyncadd [#allocation6], 4294965248  ;;  %v44_v0 = vld [vmem:[#allocation5] sm:$0xff]  ;;  %v45_v1 = vld [vmem:[#allocation5 + $0x8] sm:$0xff]  ;;  %s377_s1 = smov [#allocation7]  }
  0x27   :  { %v46_v2 = vld [vmem:[#allocation5 + $0x10] sm:$0xff]  ;;  %v248_v3 = vpack.c.bf16 %v45_v1, %v44_v0  ;;  %v47_v4 = vld [vmem:[#allocation5 + $0x18] sm:$0xff]  ;;  %v48_v6 = vld [vmem:[#allocation5 + $0x20] sm:$0xff]  ;;  %s180_s6 = sshll.u32 %s377_s1, 4  ;;  %s181_s6 = int_to_ptr.vmem [resolvable:$true] %s180_s6 }
  0x28   :  { %v252_v5 = vpack.c.bf16 %v47_v4, %v46_v2  ;;  %v49_v7 = vld [vmem:[#allocation5 + $0x28] sm:$0xff]  ;;  %v423_v9 = vld [vmem:[#allocation2] sm:$0xff]  ;;  %v51_v11 = vld [vmem:[#allocation5 + $0x38] sm:$0xff]  ;;  %s345_s7 = scalar_lea.vmem %s181_s6, 256  ;;  %p350_p3 = scmp.lt.s32.totalorder %s181_s6, %s181_s6 }
  0x29   :  { %249 = vmatprep.subr.bf16.mxu0 %v248_v3  ;;  %v256_v8 = vpack.c.bf16 %v49_v7, %v48_v6  ;;  %v50_v10 = vld [vmem:[#allocation5 + $0x30] sm:$0xff]  ;;  %v42_v12 = vmul.f32 %v423_v9, %v423_v9  ;;  %v52_v14 = vld [vmem:[#allocation5 + $0x40] sm:$0xff]  ;;  %v53_v15 = vld [vmem:[#allocation5 + $0x48] sm:$0xff]  ;;  %p346_p2 = scmp.ne.s32.totalorder %s181_s6, %s345_s7  ;;  %p351_p4 = scmp.lt.s32.totalorder %s345_s7, %s345_s7 }
  0x2a   :  { %251 = vmatpush3.bf16.msra.mxu0 %v248_v3  ;;  %v260_v13 = vpack.c.bf16 %v51_v11, %v50_v10  ;;  %v264_v16 = vpack.c.bf16 %v53_v15, %v52_v14  ;;  %v54_v17 = vld [vmem:[#allocation5 + $0x50] sm:$0xff]  ;;  %v55_v18 = vld [vmem:[#allocation5 + $0x58] sm:$0xff]  ;;  %v56_v20 = vld [vmem:[#allocation5 + $0x60] sm:$0xff] }
  0x2b   :  { %253 = vmatprep.subr.bf16.mxu0 %v252_v5  ;;  %245 = vmatprep.mubr.f32.mxu0 %v42_v12  ;;  %v268_v19 = vpack.c.bf16 %v55_v18, %v54_v17  ;;  %v57_v21 = vld [vmem:[#allocation5 + $0x68] sm:$0xff]  ;;  %v58_v23 = vld [vmem:[#allocation5 + $0x70] sm:$0xff]  ;;  %v59_v24 = vld [vmem:[#allocation5 + $0x78] sm:$0xff]  ;;  %p352_p5 = por %p351_p4, %p350_p3 }
  0x2c   :  { %v272_v22 = vpack.c.bf16 %v57_v21, %v56_v20  ;;  %v276_v25 = vpack.c.bf16 %v59_v24, %v58_v23  ;;  %v41_v26 = vld [vmem:[#allocation2 + $0x8] sm:$0xff] }
  0x2d   :  { %v43_v27 = vmul.f32 %v41_v26, %v41_v26  ;;  %p353_p6 = pnand %p352_p5, %p346_p2 }
  0x2e   :  { %255 = vmatpush3.bf16.msra.mxu0 %v252_v5 }
  0x2f   :  { %257 = vmatprep.subr.bf16.mxu0 %v256_v8 }
  0x32   :  { %259 = vmatpush3.bf16.msra.mxu0 %v256_v8 }
  0x33   :  { %261 = vmatprep.subr.bf16.mxu0 %v260_v13 }
  0x36   :  { %263 = vmatpush3.bf16.msra.mxu0 %v260_v13 }
  0x37   :  { %265 = vmatprep.subr.bf16.mxu0 %v264_v16 }
  0x3a   :  { %267 = vmatpush3.bf16.msra.mxu0 %v264_v16 }
  0x3b   :  { %269 = vmatprep.subr.bf16.mxu0 %v268_v19 }
  0x3e   :  { %271 = vmatpush3.bf16.msra.mxu0 %v268_v19 }
  0x3f   :  { %273 = vmatprep.subr.bf16.mxu0 %v272_v22 }
  0x42   :  { %275 = vmatpush3.bf16.msra.mxu0 %v272_v22 }
  0x43   :  { %277 = vmatprep.subr.bf16.mxu0 %v276_v25 }
  0x46   :  { %279 = vmatpush3.bf16.msra.mxu0 %v276_v25 }
  0x49   :  { %246 = vmatmul.mubr.f32.vlgmr.msra.gmra.mrb[0].mxu0 %v43_v27 }
 0x11c   :  { %v247_v28 = vpop.f32.mrb[0].mxu0 }
 0x11d   :  { %v136_v29 = vmax.f32 %v247_v28, 1e-30  ;;  %v126_v30 = vpop.f32.mrb[1].mxu0 }
 0x11e   :  { %v135_v31 = vmax.f32 %v126_v30, 1e-30 }
 0x11f   :  { %285 = vrsqrt.f32 %v136_v29 }
 0x120   :  { %287 = vrsqrt.f32 %v135_v31 }
 0x129   :  { %v286_v32 = vpop.eup %285 }
 0x12a   :  { %v288_v33 = vpop.eup %287  ;;  %v140_v34 = vmul.f32 %v286_v32, %v136_v29  ;;  %v142_v48 = vmul.f32 0.996, %v286_v32 }
 0x12b   :  { %v139_v35 = vmul.f32 %v288_v33, %v135_v31  ;;  %v141_v50 = vmul.f32 0.996, %v288_v33 }
 0x12c   :  { %v146_v36 = vmin.f32 %v140_v34, 0.996  ;;  %v144_v54 = vmin.f32 %v142_v48, 1.0 }
 0x12d   :  { %v145_v37 = vmin.f32 %v139_v35, 0.996  ;;  %v143_v56 = vmin.f32 %v141_v50, 1.0 }
 0x12e   :  { %v194_v38 = vclamps-f32 %v146_v36, 1.0 }
 0x12f   :  { %v193_v39 = vclamps-f32 %v145_v37, 1.0 }
 0x130   :  { %v154_v40 = vsub.f32 1.0, %v194_v38  ;;  %v152_v42 = vadd.f32 1.0, %v194_v38 }
 0x131   :  { %v153_v41 = vsub.f32 1.0, %v193_v39  ;;  %v151_v44 = vadd.f32 1.0, %v193_v39 }
 0x132   :  { %289 = vrcp.f32 %v154_v40 }
 0x133   :  { %291 = vrcp.f32 %v153_v41 }
 0x13c   :  { %v290_v43 = vpop.eup %289 }
 0x13d   :  { %v292_v45 = vpop.eup %291  ;;  %v158_v46 = vmul.f32 %v290_v43, %v152_v42 }
 0x13e   :  { %v156_v47 = vmul.f32 %v292_v45, %v151_v44 }
 0x13f   :  { %293 = vlog2.f32 %v158_v46 }
 0x140   :  { %295 = vlog2.f32 %v156_v47 }
 0x141   :  { %297 = vrcp.f32 %v146_v36 }
 0x142   :  { %299 = vrcp.f32 %v145_v37 }
 0x149   :  { %v294_v49 = vpop.eup %293 }
 0x14a   :  { %v296_v51 = vpop.eup %295  ;;  %v162_v52 = vmul.f32 0.6931472, %v294_v49 }
 0x14b   :  { %v160_v53 = vmul.f32 0.6931472, %v296_v51  ;;  %v298_v59 = vpop.eup %297 }
 0x14c   :  { %v164_v55 = vmul.f32 0.5, %v162_v52  ;;  %v300_v61 = vpop.eup %299 }
 0x14d   :  { %v163_v57 = vmul.f32 0.5, %v160_v53 }
 0x14e   :  { %v166_v58 = vmul.f32 %v164_v55, %v144_v54 }
 0x14f   :  { %v165_v60 = vmul.f32 %v163_v57, %v143_v56 }
 0x150   :  { %v170_v62 = vmul.f32 %v298_v59, %v166_v58 }
 0x151   :  { %v168_v63 = vmul.f32 %v300_v61, %v165_v60 }
 0x152   :  { %v172_v0 = vmul.f32 %v170_v62, %v41_v26 }
 0x153   :  { %v171_v1 = vmul.f32 %v168_v63, %v423_v9 }
 0x154   :  { %174 = vst [vmem:[#allocation7 + $0x8] sm:$0xff] %v172_v0 }
 0x155   :  { %173 = vst [vmem:[#allocation7] sm:$0xff] %v171_v1 }
 0x156   :  { %356 = shalt.err (!%p353_p6)
}
 0x157   :  { %s357_s10 = scalar_lea.hbm %s445_s2, 256 }
 0x158   :  { %p358_p7 = scmp.ne.s32.totalorder %s445_s2, %s357_s10  ;;  %p361_p8 = scmp.lt.u32.totalorder %s357_s10, %s445_s2 }
 0x15a   :  { %p363_p9 = pnand %p361_p8, %p358_p7 }
 0x15c   :  { %366 = shalt.err (!%p363_p9)
}
 0x15d   :  { %186 = dma.vmem_to_hbm [thread:$0]  %s181_s6, 256, %s445_s2, [#allocation4], %s374_s19, %s374_s19, %s375_s20  }
 0x15e   :  { %371 = dma.done.wait [#allocation4], 256  }
 0x15f   :  { %372 = vsyncadd [#allocation4], 4294967040 }
 0x160   :  { %190 = vsyncpa [#allocation3], 1 }
 0x161   :  { %191 = vsyncpa [#allocation6], 1 }
 0x162   :  { %192 = vsyncpa [#allocation4], 1 }

</bundles_post_ra>
